<compile_context>
chip_gen: v7x
topology: tpu7x:2x2x1
jax: 0.10.0
libtpu: 0.0.40
codegen_flags: <defaults>
</compile_context>

<pallas_src>
import functools

import jax
import jax.numpy as jnp
from jax import lax
from jax.experimental import pallas as pl
from jax.experimental.pallas import tpu as pltpu


def _round_up(x: int, m: int) -> int:
    return (x + m - 1) // m * m


def _mcc_kernel(logits_ref, out_ref, denom_acc, diag_acc, *,
                temperature: float, batch: int, num_classes: int,
                block_b: int):
    step = pl.program_id(0)

    @pl.when(step == 0)
    def _init():
        denom_acc[...] = jnp.zeros_like(denom_acc)
        diag_acc[...] = jnp.zeros_like(diag_acc)

    x = logits_ref[...].astype(jnp.float32)            # (tb, Cpad)
    tb, cpad = x.shape

    # softmax(logits / T), numerically stable.  Padded class columns were
    # filled with -1e30 in the wrapper, so their probability is exactly 0.
    scaled = x * jnp.float32(1.0 / temperature)
    m = jnp.max(scaled, axis=1, keepdims=True)          # (tb, 1)
    e = jnp.exp(scaled - m)
    s = jnp.sum(e, axis=1, keepdims=True)               # (tb, 1)
    p = e * (1.0 / s)                                   # (tb, Cpad)
    # NOTE: pl.reciprocal(approx=True) was evaluated here but its ~2^-12
    # relative error can break the 1e-5 reference tolerance, so exact divide
    # of the (tb,1) row-sum is kept (still only tb divides, not tb*Cpad).

    # Entropy weights (dalib uses eps = 1e-5 inside the log).  Padded columns
    # contribute p*log(p+eps) = 0.  The batch-wide renormalization cancels in
    # diag/denom, so the raw weights are used directly (no cross-tile pass).
    eps = jnp.float32(1e-5)
    h = -jnp.sum(p * jnp.log(p + eps), axis=1, keepdims=True)    # (tb, 1)
    w = 1.0 + jnp.exp(-h)                                        # (tb, 1)

    # Mask out padded batch rows.
    row = step * block_b + lax.broadcasted_iota(jnp.int32, (tb, 1), 0)
    w = jnp.where(row < batch, w, 0.0)

    wp = w * p                                                   # (tb, Cpad)
    denom_acc[...] += jnp.sum(wp, axis=0, keepdims=True)         # (1, Cpad)
    diag_acc[...] += jnp.sum(wp * p, axis=0, keepdims=True)      # (1, Cpad)

    @pl.when(step == pl.num_programs(0) - 1)
    def _finalize():
        col = lax.broadcasted_iota(jnp.int32, (1, cpad), 1)
        valid = col < num_classes
        # Guard against 0/0 (padded columns or fully-underflowed classes).
        denom = jnp.maximum(denom_acc[...], jnp.float32(1e-30))
        ratio = jnp.where(valid, diag_acc[...] / denom, 0.0)     # (1, Cpad)
        loss = 1.0 - jnp.sum(ratio, keepdims=True) * jnp.float32(1.0 / num_classes)
        out_ref[0, 0] = loss[0, 0]


def mcc_loss(logits: jax.Array, temperature: float, *,
             block_b: int = 256) -> jax.Array:
    """Minimum Class Confusion loss. logits: (batch, num_classes) -> scalar."""
    assert logits.ndim == 2
    B, C = logits.shape

    # Lane-dense class dimension: pad C up to a multiple of 128.
    cpad = _round_up(C, 128)
    # Batch tile: multiple of 8 sublanes, capped so the double-buffered logits
    # tile stays well inside the default scoped-VMEM budget on every chip
    # generation (v7x has only 64 MiB physical VMEM).
    max_tile_bytes = 4 * 1024 * 1024
    tb_cap = max(8, (max_tile_bytes // (cpad * 4)) // 8 * 8)
    tb = min(_round_up(block_b, 8), _round_up(B, 8), tb_cap)
    bpad = _round_up(B, tb)

    x = logits
    if bpad != B:
        x = jnp.pad(x, ((0, bpad - B), (0, 0)))                         # rows: masked in-kernel
    if cpad != C:
        x = jnp.pad(x, ((0, 0), (0, cpad - C)), constant_values=-1e30)  # cols: softmax -> 0

    kernel = functools.partial(
        _mcc_kernel, temperature=float(temperature),
        batch=B, num_classes=C, block_b=tb)

    itemsize = jnp.dtype(x.dtype).itemsize
    out = pl.pallas_call(
        kernel,
        out_shape=jax.ShapeDtypeStruct((1, 1), jnp.float32),
        grid=(bpad // tb,),                                   # batch reduction grid
        in_specs=[pl.BlockSpec((tb, cpad), lambda i: (i, 0))],
        out_specs=pl.BlockSpec(memory_space=pltpu.MemorySpace.SMEM),
        scratch_shapes=[pltpu.VMEM((1, cpad), jnp.float32),   # denom accumulator
                        pltpu.VMEM((1, cpad), jnp.float32)],  # diag accumulator
        compiler_params=pltpu.CompilerParams(
            dimension_semantics=("arbitrary",)),              # carried accumulators
        cost_estimate=pl.CostEstimate(
            flops=12 * bpad * cpad,
            transcendentals=2 * bpad * cpad + bpad,
            bytes_accessed=bpad * cpad * itemsize + 4),
    )(x)
    return out[0, 0]


def _mcc_loss_ref(logits: jax.Array, temperature: float) -> jax.Array:
    """Pure-JAX reference mirroring the PyTorch forward (explicit P^T W P)."""
    B, C = logits.shape
    p = jax.nn.softmax(logits.astype(jnp.float32) / temperature, axis=1)
    H = -jnp.sum(p * jnp.log(p + 1e-5), axis=1)
    w = 1.0 + jnp.exp(-H)
    w = (B * w / jnp.sum(w))[:, None]
    ccm = (p * w).T @ p
    ccm = ccm / jnp.sum(ccm, axis=1)
    return (jnp.sum(ccm) - jnp.trace(ccm)) / C


if __name__ == "__main__":
    temperature = 2.0

    # Primary example, matching the PyTorch usage: logits (batch, num_classes).
    batch_size, num_classes = 8, 32
    g_t = jax.random.normal(jax.random.PRNGKey(0),
                            (batch_size, num_classes), dtype=jnp.float32)
    loss = jax.block_until_ready(mcc_loss(g_t, temperature))
    ref = jax.block_until_ready(_mcc_loss_ref(g_t, temperature))
    assert jnp.allclose(loss, ref, atol=1e-5, rtol=1e-5), (loss, ref)

    # Extra checks: (13, 37) exercises the row/column padding masks
    # (C not a lane multiple, B not a sublane multiple); (24, 32) with
    # block_b=8 exercises the multi-step batch-reduction grid.
    for (b, c), kw in (((13, 37), {}), ((24, 32), dict(block_b=8))):
        g = jax.random.normal(jax.random.PRNGKey(1), (b, c), dtype=jnp.float32)
        l = jax.block_until_ready(mcc_loss(g, temperature, **kw))
        r = jax.block_until_ready(_mcc_loss_ref(g, temperature))
        assert jnp.allclose(l, r, atol=1e-5, rtol=1e-5), ((b, c), l, r)

    print("KERNEL_OK")
</pallas_src>

<mosaic_0001>
module attributes {stable_mosaic.version = 11 : i64} {
  func.func @_mcc_kernel(%arg0: i32, %arg1: memref<8x128xf32, #tpu.memory_space<vmem>>, %arg2: memref<1x1xf32, #tpu.memory_space<smem>>, %arg3: memref<1x128xf32, #tpu.memory_space<vmem>>, %arg4: memref<1x128xf32, #tpu.memory_space<vmem>>) attributes {dimension_semantics = [#tpu.dimension_semantics<arbitrary>], iteration_bounds = array<i64: 1>, scalar_prefetch = 0 : i64, scratch_operands = 2 : i64, tpu.core_type = #tpu.core_type<tc>, window_params = [{transform_indices = @transform_0, window_bounds = array<i64: 8, 128>}, {transform_indices = @transform_1, window_bounds = array<i64: 1, 1>}]} {
    %c0_i32 = arith.constant 0 : i32
    %0 = arith.cmpi eq, %arg0, %c0_i32 : i32
    %1 = arith.extui %0 : i1 to i32
    %c0_i32_0 = arith.constant 0 : i32
    %2 = arith.cmpi ne, %1, %c0_i32_0 : i32
    scf.if %2 {
      %cst_24 = arith.constant 0.000000e+00 : f32
      %54 = vector.broadcast %cst_24 : f32 to vector<1x128xf32>
      %c0_25 = arith.constant 0 : index
      %c0_26 = arith.constant 0 : index
      %55 = vector.load %arg3[%c0_25, %c0_26] : memref<1x128xf32, #tpu.memory_space<vmem>>, vector<1x128xf32>
      tpu.vector_store %arg3[%c0_25, %c0_26], %54 {strides = array<i32>} : memref<1x128xf32, #tpu.memory_space<vmem>>, vector<1x128xf32>,
      %cst_27 = arith.constant 0.000000e+00 : f32
      %56 = vector.broadcast %cst_27 : f32 to vector<1x128xf32>
      %c0_28 = arith.constant 0 : index
      %c0_29 = arith.constant 0 : index
      %57 = vector.load %arg4[%c0_28, %c0_29] : memref<1x128xf32, #tpu.memory_space<vmem>>, vector<1x128xf32>
      tpu.vector_store %arg4[%c0_28, %c0_29], %56 {strides = array<i32>} : memref<1x128xf32, #tpu.memory_space<vmem>>, vector<1x128xf32>,
    } else {
    }
    %c0 = arith.constant 0 : index
    %c0_1 = arith.constant 0 : index
    %3 = vector.load %arg1[%c0, %c0_1] : memref<8x128xf32, #tpu.memory_space<vmem>>, vector<8x128xf32>
    %cst = arith.constant 5.000000e-01 : f32
    %4 = vector.broadcast %cst : f32 to vector<8x128xf32>
    %5 = arith.mulf %3, %4 : vector<8x128xf32>
    %cst_2 = arith.constant dense<0xFF800000> : vector<8xf32>
    %6 = vector.multi_reduction <maximumf>, %5, %cst_2 [1] : vector<8x128xf32> to vector<8xf32>
    %7 = vector.shape_cast %6 : vector<8xf32> to vector<8x1xf32>
    %8 = vector.broadcast %7 : vector<8x1xf32> to vector<8x128xf32>
    %9 = arith.subf %5, %8 : vector<8x128xf32>
    %10 = math.exp %9 : vector<8x128xf32>
    %cst_3 = arith.constant dense<0.000000e+00> : vector<8xf32>
    %11 = vector.multi_reduction <add>, %10, %cst_3 [1] : vector<8x128xf32> to vector<8xf32>
    %12 = vector.shape_cast %11 : vector<8xf32> to vector<8x1xf32>
    %cst_4 = arith.constant 1.000000e+00 : f32
    %13 = vector.broadcast %cst_4 : f32 to vector<8x1xf32>
    %14 = arith.divf %13, %12 : vector<8x1xf32>
    %15 = vector.broadcast %14 : vector<8x1xf32> to vector<8x128xf32>
    %16 = arith.mulf %10, %15 : vector<8x128xf32>
    %cst_5 = arith.constant 9.99999974E-6 : f32
    %17 = vector.broadcast %cst_5 : f32 to vector<8x128xf32>
    %18 = arith.addf %16, %17 : vector<8x128xf32>
    %19 = math.log %18 : vector<8x128xf32>
    %20 = arith.mulf %16, %19 : vector<8x128xf32>
    %cst_6 = arith.constant dense<0.000000e+00> : vector<8xf32>
    %21 = vector.multi_reduction <add>, %20, %cst_6 [1] : vector<8x128xf32> to vector<8xf32>
    %22 = vector.shape_cast %21 : vector<8xf32> to vector<8x1xf32>
    %cst_7 = arith.constant 0.000000e+00 : f32
    %23 = vector.broadcast %cst_7 : f32 to vector<8x1xf32>
    %24 = arith.subf %23, %22 : vector<8x1xf32>
    %cst_8 = arith.constant 0.000000e+00 : f32
    %25 = vector.broadcast %cst_8 : f32 to vector<8x1xf32>
    %26 = arith.subf %25, %24 : vector<8x1xf32>
    %27 = math.exp %26 : vector<8x1xf32>
    %cst_9 = arith.constant 1.000000e+00 : f32
    %28 = vector.broadcast %cst_9 : f32 to vector<8x1xf32>
    %29 = arith.addf %28, %27 : vector<8x1xf32>
    %c8_i32 = arith.constant 8 : i32
    %30 = arith.muli %arg0, %c8_i32 : i32
    %31 = tpu.iota {dimensions = array<i32: 0>} : vector<8x1xi32>
    %32 = vector.broadcast %30 : i32 to vector<8x1xi32>
    %33 = arith.addi %32, %31 : vector<8x1xi32>
    %c8_i32_10 = arith.constant 8 : i32
    %34 = vector.broadcast %c8_i32_10 : i32 to vector<8x1xi32>
    %35 = arith.cmpi slt, %33, %34 : vector<8x1xi32>
    %cst_11 = arith.constant 0.000000e+00 : f32
    %36 = vector.broadcast %cst_11 : f32 to vector<8x1xf32>
    %37 = arith.select %35, %29, %36 : vector<8x1xi1>, vector<8x1xf32>
    %38 = vector.broadcast %37 : vector<8x1xf32> to vector<8x128xf32>
    %39 = arith.mulf %38, %16 : vector<8x128xf32>
    %c0_12 = arith.constant 0 : index
    %c0_13 = arith.constant 0 : index
    %40 = vector.load %arg3[%c0_12, %c0_13] : memref<1x128xf32, #tpu.memory_space<vmem>>, vector<1x128xf32>
    %cst_14 = arith.constant dense<0.000000e+00> : vector<128xf32>
    %41 = vector.multi_reduction <add>, %39, %cst_14 [0] : vector<8x128xf32> to vector<128xf32>
    %42 = vector.shape_cast %41 : vector<128xf32> to vector<1x128xf32>
    %43 = arith.addf %40, %42 : vector<1x128xf32>
    %c0_15 = arith.constant 0 : index
    %c0_16 = arith.constant 0 : index
    %44 = vector.load %arg3[%c0_15, %c0_16] : memref<1x128xf32, #tpu.memory_space<vmem>>, vector<1x128xf32>
    tpu.vector_store %arg3[%c0_15, %c0_16], %43 {strides = array<i32>} : memref<1x128xf32, #tpu.memory_space<vmem>>, vector<1x128xf32>,
    %c0_17 = arith.constant 0 : index
    %c0_18 = arith.constant 0 : index
    %45 = vector.load %arg4[%c0_17, %c0_18] : memref<1x128xf32, #tpu.memory_space<vmem>>, vector<1x128xf32>
    %46 = arith.mulf %39, %16 : vector<8x128xf32>
    %cst_19 = arith.constant dense<0.000000e+00> : vector<128xf32>
    %47 = vector.multi_reduction <add>, %46, %cst_19 [0] : vector<8x128xf32> to vector<128xf32>
    %48 = vector.shape_cast %47 : vector<128xf32> to vector<1x128xf32>
    %49 = arith.addf %45, %48 : vector<1x128xf32>
    %c0_20 = arith.constant 0 : index
    %c0_21 = arith.constant 0 : index
    %50 = vector.load %arg4[%c0_20, %c0_21] : memref<1x128xf32, #tpu.memory_space<vmem>>, vector<1x128xf32>
    tpu.vector_store %arg4[%c0_20, %c0_21], %49 {strides = array<i32>} : memref<1x128xf32, #tpu.memory_space<vmem>>, vector<1x128xf32>,
    %c0_i32_22 = arith.constant 0 : i32
    %51 = arith.cmpi eq, %arg0, %c0_i32_22 : i32
    %52 = arith.extui %51 : i1 to i32
    %c0_i32_23 = arith.constant 0 : i32
    %53 = arith.cmpi ne, %52, %c0_i32_23 : i32
    scf.if %53 {
      %54 = tpu.iota {dimensions = array<i32: 1>} : vector<1x128xi32>
      %c32_i32 = arith.constant 32 : i32
      %55 = vector.broadcast %c32_i32 : i32 to vector<1x128xi32>
      %56 = arith.cmpi slt, %54, %55 : vector<1x128xi32>
      %c0_24 = arith.constant 0 : index
      %c0_25 = arith.constant 0 : index
      %57 = vector.load %arg3[%c0_24, %c0_25] : memref<1x128xf32, #tpu.memory_space<vmem>>, vector<1x128xf32>
      %cst_26 = arith.constant 1.000000e-30 : f32
      %58 = vector.broadcast %cst_26 : f32 to vector<1x128xf32>
      %59 = arith.maximumf %57, %58 : vector<1x128xf32>
      %c0_27 = arith.constant 0 : index
      %c0_28 = arith.constant 0 : index
      %60 = vector.load %arg4[%c0_27, %c0_28] : memref<1x128xf32, #tpu.memory_space<vmem>>, vector<1x128xf32>
      %61 = arith.divf %60, %59 : vector<1x128xf32>
      %cst_29 = arith.constant 0.000000e+00 : f32
      %62 = vector.broadcast %cst_29 : f32 to vector<1x128xf32>
      %63 = arith.select %56, %61, %62 : vector<1x128xi1>, vector<1x128xf32>
      %64 = vector.shape_cast %63 : vector<1x128xf32> to vector<1x1x128xf32>
      %cst_30 = arith.constant dense<0.000000e+00> : vector<1xf32>
      %65 = vector.multi_reduction <add>, %64, %cst_30 [1, 2] : vector<1x1x128xf32> to vector<1xf32>
      %66 = vector.shape_cast %65 : vector<1xf32> to vector<1x1x1xf32>
      %67 = vector.extract %66[0, 0, 0] : f32 from vector<1x1x1xf32>
      %68 = vector.broadcast %67 : f32 to vector<1x1xf32>
      %cst_31 = arith.constant 3.125000e-02 : f32
      %69 = vector.broadcast %cst_31 : f32 to vector<1x1xf32>
      %70 = arith.mulf %68, %69 : vector<1x1xf32>
      %cst_32 = arith.constant 1.000000e+00 : f32
      %71 = vector.broadcast %cst_32 : f32 to vector<1x1xf32>
      %72 = arith.subf %71, %70 : vector<1x1xf32>
      %73 = vector.extract %72[0, 0] : f32 from vector<1x1xf32>
      %c0_33 = arith.constant 0 : index
      %c0_34 = arith.constant 0 : index
      %74 = memref.load %arg2[%c0_33, %c0_34] : memref<1x1xf32, #tpu.memory_space<smem>>
      memref.store %73, %arg2[%c0_33, %c0_34] : memref<1x1xf32, #tpu.memory_space<smem>>
    } else {
    }
    return
  }
  func.func @transform_0(%arg0: i32) -> (i32, i32) {
    %c0_i32 = arith.constant 0 : i32
    %c0_i32_0 = arith.constant 0 : i32
    return %arg0, %c0_i32 : i32, i32
  }
  func.func @transform_1(%arg0: i32) -> (i32, i32) {
    %c0_i32 = arith.constant 0 : i32
    %c0_i32_0 = arith.constant 0 : i32
    %c0_i32_1 = arith.constant 0 : i32
    return %c0_i32, %c0_i32_0 : i32, i32
  }
}

</mosaic_0001>

<bundles_post_ra>
// kernel: tpu_custom_call.1
= control target key start
LH: loop header
LB: loop body
LE: loop exit
PB: predicated region body
PF: predicated region fallthrough
CT: control target
= control target key end

     0   :  { %6 = vsyncpa [#allocation5], 0  ;;  %s210_s0 = inlined_call_operand.hbm [shape: f32[8,128], index: 0, kind: input, shape index: {}]   ;;  %s211_s1 = inlined_call_operand.hbm [shape: f32[1,1], index: 1, kind: output, shape index: {}]  }
   0x1   :  { %7 = vsyncpa [#allocation6], 0  ;;  %s173_s6 = smov [#allocation4]   ;;  %s137_s10 = scalar_lea.hbm %s210_s0, 128 }
   0x2   :  { %s14_s7 = sshll.u32 %s173_s6, 4  ;;  %p138_p0 = scmp.ne.s32.totalorder %s210_s0, %s137_s10  ;;  %s15_s7 = int_to_ptr.vmem [resolvable:$true] %s14_s7 }
   0x3   :  { %p141_p1 = scmp.lt.u32.totalorder %s137_s10, %s210_s0 }
   0x5   :  { %p143_p2 = pnand %p141_p1, %p138_p0 }
   0x7   :  { %146 = shalt.err (!%p143_p2)
}
   0x8   :  { %s147_s15 = scalar_lea.vmem %s15_s7, 128  ;;  %p152_p4 = scmp.lt.s32.totalorder %s15_s7, %s15_s7 }
   0x9   :  { %p148_p3 = scmp.ne.s32.totalorder %s15_s7, %s147_s15  ;;  %p153_p5 = scmp.lt.s32.totalorder %s147_s15, %s147_s15 }
   0xb   :  { %p154_p6 = por %p153_p5, %p152_p4 }
   0xd   :  { %p155_p7 = pnand %p154_p6, %p148_p3 }
   0xf   :  { %158 = shalt.err (!%p155_p7)
}
  0x10   :  { %17 = dma.hbm_to_vmem [thread:$0]  %s210_s0, 128, %s15_s7, [#allocation5]  }
  0x11   :  { %169 = dma.done.wait [#allocation5], 128  }
  0x12   :  { %170 = vsyncadd [#allocation5], 4294967168  ;;  %v27_v0 = vld [vmem:[#allocation4] sm:$0xff]  ;;  %v174_v6 = vmov 0.0   ;;  %v80_v40 = vlaneseq  ;;  %vm89_vm1 = vcmask 1040384   ;;  %s159_s21 = scalar_lea.hbm %s211_s1, 16 }
  0x13   :  { %v28_v1 = vmul.f32 0.5, %v27_v0  ;;  %25 = vst [vmem:[#allocation2] sm:$0x1] %v174_v6  ;;  %26 = vst [vmem:[#allocation3] sm:$0x1] %v174_v6  ;;  %p160_p8 = scmp.ne.s32.totalorder %s211_s1, %s159_s21  ;;  %p163_p9 = scmp.lt.u32.totalorder %s159_s21, %s211_s1 }
  0x14   :  { %v81_v41 = vand.u32 127, %v80_v40 }
  0x15   :  { %29 = vmax.xlane.f32.xlu0 %v28_v1  ;;  %p165_p10 = pnand %p163_p9, %p160_p8 }
  0x16   :  { %vm82_vm0 = vcmp.lt.s32.totalorder %v81_v41, 32 }
  0x1a   :  { %v58_v31 = vld [vmem:[#allocation2] sm:$0x1]  ;;  %v67_v34 = vld [vmem:[#allocation3] sm:$0x1] }
  0xa2   :  { %v30_v2 = vpop.xlane.xlu0 %29 }
  0xa3   :  { %v31_v3 = vsub.f32 %v28_v1, %v30_v2 }
  0xa5   :  { %v32_v4 = vmul.f32 1.442695, %v31_v3 }
  0xa7   :  { %127 = vpow2.f32 %v32_v4 }
  0xb1   :  { %v128_v5 = vpop.eup %127 }
  0xb2   :  { %34 = vadd.xlane.f32.xlu0 %v128_v5 }
 0x13f   :  { %v35_v7 = vpop.xlane.xlu0 %34 }
 0x140   :  { %129 = vrcp.f32 %v35_v7 }
 0x14a   :  { %v130_v8 = vpop.eup %129 }
 0x14b   :  { %v38_v9 = vmul.f32 %v130_v8, %v128_v5 }
 0x14d   :  { %v39_v10 = vadd.f32 1e-05, %v38_v9 }
 0x14f   :  { %131 = vlog2.f32 %v39_v10 }
 0x159   :  { %v132_v11 = vpop.eup %131 }
 0x15a   :  { %v41_v12 = vmul.f32 0.6931472, %v132_v11 }
 0x15c   :  { %v42_v13 = vmul.f32 %v41_v12, %v38_v9 }
 0x15e   :  { %43 = vadd.xlane.f32.xlu1 %v42_v13 }
 0x1eb   :  { %v44_v14 = vpop.xlane.xlu1 %43 }
 0x1ec   :  { %v45_v15 = vsub.f32 0.0, %v44_v14 }
 0x1ee   :  { %v46_v16 = vsub.f32 0.0, %v45_v15 }
 0x1f0   :  { %v47_v17 = vmul.f32 1.442695, %v46_v16 }
 0x1f2   :  { %133 = vpow2.f32 %v47_v17 }
 0x1fc   :  { %v134_v18 = vpop.eup %133 }
 0x1fd   :  { %v49_v19 = vadd.f32 1.0, %v134_v18 }
 0x1ff   :  { %v57_v20 = vmul.f32 %v49_v19, %v38_v9 }
 0x201   :  { %v59_v21 = vrot.slane %v57_v20, 4  ;;  %v68_v22 = vmul.f32 %v57_v20, %v38_v9 }
 0x203   :  { %v60_v23 = vadd.f32 %v59_v21, %v57_v20  ;;  %v69_v24 = vrot.slane %v68_v22, 4 }
 0x205   :  { %v61_v25 = vrot.slane %v60_v23, 2  ;;  %v70_v26 = vadd.f32 %v69_v24, %v68_v22 }
 0x207   :  { %v62_v27 = vadd.f32 %v61_v25, %v60_v23  ;;  %v71_v28 = vrot.slane %v70_v26, 2 }
 0x209   :  { %v63_v29 = vrot.slane %v62_v27, 1  ;;  %v72_v30 = vadd.f32 %v71_v28, %v70_v26 }
 0x20b   :  { %v64_v32 = vadd.f32 %v63_v29, %v62_v27  ;;  %v73_v33 = vrot.slane %v72_v30, 1 }
 0x20d   :  { %v65_v35 = vadd.f32 %v64_v32, %v58_v31  ;;  %v74_v36 = vadd.f32 %v73_v33, %v72_v30 }
 0x20f   :  { %66 = vst [vmem:[#allocation2] sm:$0x1] %v65_v35  ;;  %v75_v37 = vadd.f32 %v74_v36, %v67_v34 }
 0x211   :  { %76 = vst [vmem:[#allocation3] sm:$0x1] %v75_v37 }
 0x216   :  { %v83_v38 = vld [vmem:[#allocation2] sm:$0x1] }
 0x217   :  { %v84_v39 = vmax.f32 %v83_v38, 1e-30 }
 0x218   :  { %v85_v43 = vld [vmem:[#allocation3] sm:$0x1] }
 0x219   :  { %135 = vrcp.f32 %v84_v39 }
 0x223   :  { %v136_v42 = vpop.eup %135 }
 0x224   :  { %v87_v44 = vmul.f32 %v136_v42, %v85_v43 }
 0x226   :  { %v88_v45 = vsel %vm82_vm0, %v87_v44, 0.0 }
 0x227   :  { %v90_v46 = vsel %vm89_vm1, %v88_v45, 0.0 }
 0x228   :  { %91 = vadd.xlane.f32.xlu1 %v90_v46 }
 0x2b5   :  { %v92_v47 = vpop.xlane.xlu1 %91 }
 0x2b6   :  { %v93_v48 = vrot.slane %v92_v47, 4 }
 0x2b8   :  { %v94_v49 = vadd.f32 %v93_v48, %v92_v47 }
 0x2ba   :  { %v95_v50 = vrot.slane %v94_v49, 2 }
 0x2bc   :  { %v96_v51 = vadd.f32 %v95_v50, %v94_v49 }
 0x2be   :  { %v97_v52 = vrot.slane %v96_v51, 1 }
 0x2c0   :  { %v98_v53 = vadd.f32 %v97_v52, %v96_v51 }
 0x2c2   :  { %120 = vpush %v98_v53 }
 0x2f3   :  { %s121_s0 = spop %120 }
 0x2f4   :  { %v100_v54 = vstv %s121_s0 }
 0x2f5   :  { %v101_v55 = vmul.f32 0.03125, %v100_v54 }
 0x2f7   :  { %v102_v56 = vsub.f32 1.0, %v101_v55 }
 0x2f9   :  { %122 = vpush %v102_v56 }
 0x32a   :  { %s123_s18 = spop %122 }
 0x32b   :  { %105 = sst [smem:[#allocation7]] %s123_s18 }
 0x32c   :  { %168 = shalt.err (!%p165_p10)
}
 0x32d   :  { %s175_s26 = smov [#allocation7]  }
 0x32e   :  { %113 = dma.smem_to_hbm %s175_s26, 16, %s211_s1, [#allocation6]  }
 0x32f   :  { %171 = dma.done.wait [#allocation6], 16  }
 0x330   :  { %172 = vsyncadd [#allocation6], 4294967280 }
 0x331   :  { %117 = sfence }
 0x332   :  { %118 = vsyncpa [#allocation5], 1 }
 0x333   :  { %119 = vsyncpa [#allocation6], 1 }

</bundles_post_ra>
